<compile_context>
chip_gen: v6e
topology: v6e:2x2x1
jax: 0.10.0
libtpu: 0.0.40
codegen_flags: <defaults>
</compile_context>

<pallas_src>
import functools
import math

import jax
import jax.numpy as jnp
from jax.experimental import pallas as pl
from jax.experimental.pallas import tpu as pltpu


def encoder_layer_kernel(xq_ref, xs_ref,
                         wq_ref, bq_ref, wkv_ref, bkv_ref,
                         wo_ref, bo_ref,
                         w1_ref, b1_ref, w2_ref, b2_ref,
                         g1_ref, be1_ref, g2_ref, be2_ref,
                         o_ref, kv_ref,
                         *, nhead, eps, approx_softmax):
    qi = pl.program_id(1)
    xq = xq_ref[0]                            # (TQ, D)  query tile, input dtype
    TQ, D = xq.shape
    hd = D // nhead
    scale = 1.0 / math.sqrt(hd)
    cdt = kv_ref.dtype                        # MXU operand / K-V cache dtype

    # --- K/V projection: once per batch element (qi == 0), cached in VMEM scratch. ---
    @pl.when(qi == 0)
    def _():
        xs = xs_ref[0].astype(cdt)            # (S, D) full sequence
        kv = jnp.dot(xs, wkv_ref[...],
                     preferred_element_type=jnp.float32) + bkv_ref[...]   # (S, 2D) f32
        kv_ref[0] = kv[:, :D].astype(cdt)     # K  (S, D)
        kv_ref[1] = kv[:, D:].astype(cdt)     # V  (S, D)

    # --- Query projection on the query tile only; fold 1/sqrt(hd) into q once. ---
    q = (jnp.dot(xq.astype(cdt), wq_ref[...],
                 preferred_element_type=jnp.float32) + bq_ref[...]) * scale
    q = q.astype(cdt)                          # (TQ, D)
    k = kv_ref[0]                              # (S, D) cdt
    v = kv_ref[1]                              # (S, D) cdt

    # --- Per-head attention, folded into the out-projection accumulator:
    #     concat_h(a_h) @ Wo^T == sum_h a_h @ Wo^T[lo:hi, :]  (no VMEM scratch). ---
    attn = jnp.zeros((TQ, D), jnp.float32)
    for h in range(nhead):
        lo, hi = h * hd, (h + 1) * hd
        qh = q[:, lo:hi]                       # (TQ, hd)
        kh = k[:, lo:hi]                       # (S,  hd)
        vh = v[:, lo:hi]                       # (S,  hd)
        # q @ k^T without materializing a transpose (transposed-B MXU mode).
        s = jax.lax.dot_general(qh, kh, (((1,), (1,)), ((), ())),
                                preferred_element_type=jnp.float32)       # (TQ, S)
        s = s - jnp.max(s, axis=-1, keepdims=True)
        p = jnp.exp(s)
        p = p * pl.reciprocal(jnp.sum(p, axis=-1, keepdims=True),
                              approx=approx_softmax)
        ah = jnp.dot(p.astype(cdt), vh, preferred_element_type=jnp.float32)  # (TQ, hd)
        attn = attn + jnp.dot(ah.astype(cdt), wo_ref[lo:hi, :],
                              preferred_element_type=jnp.float32)
    attn = attn + bo_ref[...]

    # --- Residual + LayerNorm 1 (post-norm), f32 VPU math. ---
    y = xq.astype(jnp.float32) + attn
    mu = jnp.mean(y, axis=-1, keepdims=True)
    var = jnp.mean((y - mu) ** 2, axis=-1, keepdims=True)
    y = (y - mu) * jax.lax.rsqrt(var + eps) * g1_ref[...] + be1_ref[...]

    # --- Feed-forward (relu), weights pre-transposed so dots are (M,K)x(K,N). ---
    # TODO(synk): tile this over dff chunks on v7x when TQ*dff f32 would spill.
    h1 = jnp.dot(y.astype(cdt), w1_ref[...],
                 preferred_element_type=jnp.float32) + b1_ref[...]
    h1 = jnp.maximum(h1, 0.0)
    ff = jnp.dot(h1.astype(cdt), w2_ref[...],
                 preferred_element_type=jnp.float32) + b2_ref[...]

    # --- Residual + LayerNorm 2. ---
    z = y + ff
    mu2 = jnp.mean(z, axis=-1, keepdims=True)
    var2 = jnp.mean((z - mu2) ** 2, axis=-1, keepdims=True)
    z = (z - mu2) * jax.lax.rsqrt(var2 + eps) * g2_ref[...] + be2_ref[...]

    o_ref[0] = z.astype(o_ref.dtype)


def _vmem_limit_bytes():
    """Per-generation VMEM limit: ~100 MiB on 128 MiB chips, ~48 MiB on v7x (64 MiB)."""
    cap = 64 * 1024 * 1024
    try:
        info = pltpu.get_tpu_info()
        cap = int(getattr(info, "vmem_capacity_bytes", cap))
    except Exception:
        pass                                   # conservative fallback (v7x-sized)
    limit = min(cap - 16 * 1024 * 1024, 100 * 1024 * 1024)
    return max(limit, 32 * 1024 * 1024)


def _pick_q_tile(S, D, dff, itemsize, vmem_limit):
    """Largest query tile whose score/FFN f32 temporaries + weights fit the budget."""
    budget = 0.6 * vmem_limit
    w_bytes = (4 * D * D + 2 * D * dff) * itemsize          # wq + wkv + wo + w1 + w2
    kv_bytes = 2 * S * D * itemsize                         # K/V scratch
    for tq in (1024, 512, 256, 128):
        if S % tq:
            continue
        f32_tmp = tq * S * 4 + tq * dff * 4 + 4 * tq * D * 4
        act_io = 2 * (tq * D + S * D) * itemsize            # double-buffered tiles
        if w_bytes + kv_bytes + f32_tmp + act_io <= budget:
            return tq
    if S % 128 == 0:
        return 128
    return S


def transformer_encoder_layer(src, params, *, nhead, eps=1e-5, q_tile=None,
                              use_bf16_matmul=False, approx_softmax=False):
    """src: (S, B, D) like PyTorch batch_first=False. Returns (S, B, D)."""
    S, B, D = src.shape
    dff = params["w1"].shape[0]
    assert D % nhead == 0, "d_model must be divisible by nhead"

    # MXU operand dtype: input dtype by default; bf16 when explicitly allowed
    # (recommended on v5e for f32 inputs; gated behind a tolerance flag).
    compute_dtype = jnp.bfloat16 if use_bf16_matmul else src.dtype

    vmem_limit = _vmem_limit_bytes()
    itemsize = jnp.dtype(compute_dtype).itemsize
    if q_tile is None:
        q_tile = _pick_q_tile(S, D, dff, itemsize, vmem_limit)
    assert S % q_tile == 0
    nq = S // q_tile

    # (S,B,D) -> (B,S,D). Kept wrapper-side (middle-axis blocks of 1 would violate
    # the (8,128) tiling rule for B>1); fuses with adjacent XLA ops.
    x = jnp.transpose(src, (1, 0, 2))

    # One-time weight pre-transposition (removes every in-kernel .T).
    wq_t = params["wqkv"][:D].T            # (D, D)
    wkv_t = params["wqkv"][D:].T           # (D, 2D)  fused K/V projection
    bq = params["bqkv"][:, :D]             # (1, D)
    bkv = params["bqkv"][:, D:]            # (1, 2D)
    wo_t = params["wo"].T                  # (D, D)
    w1_t = params["w1"].T                  # (D, dff)
    w2_t = params["w2"].T                  # (dff, D)

    kernel = functools.partial(encoder_layer_kernel, nhead=nhead, eps=eps,
                               approx_softmax=approx_softmax)

    def const(b, qi):
        return (0, 0)

    def _const_spec(shape):
        # Grid-invariant blocks: single-buffer them (halves weight VMEM footprint).
        try:
            return pl.BlockSpec(shape, const, pipeline_mode=pl.Buffered(1))
        except TypeError:                      # older BlockSpec without pipeline_mode
            return pl.BlockSpec(shape, const)

    # Advisory cost estimate (K/V proj now counted once per batch element).
    in_itemsize = jnp.dtype(src.dtype).itemsize
    flops = B * (2 * S * D * D                 # q proj
                 + 2 * S * D * (2 * D)         # fused k/v proj (once per batch)
                 + 2 * 2 * S * S * D           # QK^T + PV
                 + 2 * S * D * D               # out proj
                 + 2 * 2 * S * D * dff)        # FFN
    transcendentals = B * nhead * S * S
    wbytes = (wq_t.size + wkv_t.size + wo_t.size + w1_t.size + w2_t.size) * in_itemsize
    bytes_accessed = int(3 * x.size * in_itemsize + wbytes)
    cost = pl.CostEstimate(flops=int(flops),
                           transcendentals=int(transcendentals),
                           bytes_accessed=bytes_accessed)

    out = pl.pallas_call(
        kernel,
        out_shape=jax.ShapeDtypeStruct((B, S, D), src.dtype),
        grid_spec=pltpu.PrefetchScalarGridSpec(
            num_scalar_prefetch=0,
            grid=(B, nq),
            in_specs=[
                pl.BlockSpec((1, q_tile, D), lambda b, qi: (b, qi, 0)),  # x (query tile)
                pl.BlockSpec((1, S, D), lambda b, qi: (b, 0, 0)),        # x (full, K/V)
                _const_spec((D, D)),            # wq^T
                _const_spec((1, D)),            # bq
                _const_spec((D, 2 * D)),        # wkv^T
                _const_spec((1, 2 * D)),        # bkv
                _const_spec((D, D)),            # wo^T
                _const_spec((1, D)),            # bo
                _const_spec((D, dff)),          # w1^T
                _const_spec((1, dff)),          # b1
                _const_spec((dff, D)),          # w2^T
                _const_spec((1, D)),            # b2
                _const_spec((1, D)),            # norm1 gamma
                _const_spec((1, D)),            # norm1 beta
                _const_spec((1, D)),            # norm2 gamma
                _const_spec((1, D)),            # norm2 beta
            ],
            out_specs=pl.BlockSpec((1, q_tile, D), lambda b, qi: (b, qi, 0)),
            scratch_shapes=[pltpu.VMEM((2, S, D), compute_dtype)],   # K/V cache
        ),
        # qi carries the K/V scratch across steps -> must be "arbitrary";
        # B stays "parallel" for megacore sharding.
        compiler_params=pltpu.CompilerParams(
            dimension_semantics=("parallel", "arbitrary"),
            vmem_limit_bytes=int(vmem_limit)),
        cost_estimate=cost,
    )(x, x, wq_t, bq, wkv_t, bkv, wo_t, params["bo"],
      w1_t, params["b1"], w2_t, params["b2"],
      params["g1"], params["be1"], params["g2"], params["be2"])

    return jnp.transpose(out, (1, 0, 2))                   # (S, B, D)


def reference_forward(src, params, *, nhead, eps=1e-5):
    """Pure-JAX reference mirroring nn.TransformerEncoderLayer (post-norm, eval)."""
    S, B, D = src.shape
    hd = D // nhead
    x = jnp.transpose(src, (1, 0, 2)).astype(jnp.float32)  # (B, S, D)

    def ln(y, g, b):
        mu = jnp.mean(y, axis=-1, keepdims=True)
        var = jnp.mean((y - mu) ** 2, axis=-1, keepdims=True)
        return (y - mu) * jax.lax.rsqrt(var + eps) * g + b

    wqkv, bqkv = params["wqkv"], params["bqkv"][0]
    q = x @ wqkv[:D].T + bqkv[:D]
    k = x @ wqkv[D:2 * D].T + bqkv[D:2 * D]
    v = x @ wqkv[2 * D:].T + bqkv[2 * D:]
    q = q.reshape(B, S, nhead, hd).transpose(0, 2, 1, 3)
    k = k.reshape(B, S, nhead, hd).transpose(0, 2, 1, 3)
    v = v.reshape(B, S, nhead, hd).transpose(0, 2, 1, 3)
    s = (q @ jnp.swapaxes(k, -1, -2)) / math.sqrt(hd)
    p = jax.nn.softmax(s, axis=-1)
    a = (p @ v).transpose(0, 2, 1, 3).reshape(B, S, D)
    a = a @ params["wo"].T + params["bo"][0]

    y = ln(x + a, params["g1"][0], params["be1"][0])
    h = jnp.maximum(y @ params["w1"].T + params["b1"][0], 0.0)
    ff = h @ params["w2"].T + params["b2"][0]
    z = ln(y + ff, params["g2"][0], params["be2"][0])
    return jnp.transpose(z, (1, 0, 2))


if __name__ == "__main__":
    # Small shapes: seq=8, batch=2, d_model=32, nhead=4, dim_feedforward=64.
    S, B, D, H, DFF = 8, 2, 32, 4, 64
    key = jax.random.PRNGKey(0)
    ks = jax.random.split(key, 12)

    params = {
        "wqkv": 0.1 * jax.random.normal(ks[0], (3 * D, D), jnp.float32),
        "bqkv": 0.1 * jax.random.normal(ks[1], (1, 3 * D), jnp.float32),
        "wo":   0.1 * jax.random.normal(ks[2], (D, D), jnp.float32),
        "bo":   0.1 * jax.random.normal(ks[3], (1, D), jnp.float32),
        "w1":   0.1 * jax.random.normal(ks[4], (DFF, D), jnp.float32),
        "b1":   0.1 * jax.random.normal(ks[5], (1, DFF), jnp.float32),
        "w2":   0.1 * jax.random.normal(ks[6], (D, DFF), jnp.float32),
        "b2":   0.1 * jax.random.normal(ks[7], (1, D), jnp.float32),
        "g1":   jnp.ones((1, D), jnp.float32),
        "be1":  jnp.zeros((1, D), jnp.float32),
        "g2":   jnp.ones((1, D), jnp.float32),
        "be2":  jnp.zeros((1, D), jnp.float32),
    }

    src = jax.random.normal(ks[8], (S, B, D), jnp.float32)

    out = transformer_encoder_layer(src, params, nhead=H)
    out = jax.block_until_ready(out)

    with jax.default_matmul_precision("highest"):
        ref = reference_forward(src, params, nhead=H)
    ref = jax.block_until_ready(ref)

    assert out.shape == (S, B, D)
    max_err = float(jnp.max(jnp.abs(out - ref)))
    assert jnp.allclose(out, ref, atol=1e-2, rtol=1e-2), f"max abs err = {max_err}"

    print("KERNEL_OK")
</pallas_src>

<mosaic_0001>
module attributes {stable_mosaic.version = 11 : i64} {
  func.func @encoder_layer_kernel(%arg0: i32, %arg1: i32, %arg2: memref<1x8x32xf32, #tpu.memory_space<vmem>>, %arg3: memref<1x8x32xf32, #tpu.memory_space<vmem>>, %arg4: memref<32x32xf32, #tpu.memory_space<vmem>>, %arg5: memref<1x32xf32, #tpu.memory_space<vmem>>, %arg6: memref<32x64xf32, #tpu.memory_space<vmem>>, %arg7: memref<1x64xf32, #tpu.memory_space<vmem>>, %arg8: memref<32x32xf32, #tpu.memory_space<vmem>>, %arg9: memref<1x32xf32, #tpu.memory_space<vmem>>, %arg10: memref<32x64xf32, #tpu.memory_space<vmem>>, %arg11: memref<1x64xf32, #tpu.memory_space<vmem>>, %arg12: memref<64x32xf32, #tpu.memory_space<vmem>>, %arg13: memref<1x32xf32, #tpu.memory_space<vmem>>, %arg14: memref<1x32xf32, #tpu.memory_space<vmem>>, %arg15: memref<1x32xf32, #tpu.memory_space<vmem>>, %arg16: memref<1x32xf32, #tpu.memory_space<vmem>>, %arg17: memref<1x32xf32, #tpu.memory_space<vmem>>, %arg18: memref<1x8x32xf32, #tpu.memory_space<vmem>>, %arg19: memref<2x8x32xf32, #tpu.memory_space<vmem>>) attributes {dimension_semantics = [#tpu.dimension_semantics<parallel>, #tpu.dimension_semantics<arbitrary>], iteration_bounds = array<i64: 2, 1>, scalar_prefetch = 0 : i64, scratch_operands = 1 : i64, tpu.core_type = #tpu.core_type<tc>, window_params = [{transform_indices = @transform_0, window_bounds = array<i64: 1, 8, 32>}, {transform_indices = @transform_1, window_bounds = array<i64: 1, 8, 32>}, {pipeline_mode = #tpu.pipeline_mode<synchronous>, transform_indices = @transform_2, window_bounds = array<i64: 32, 32>}, {pipeline_mode = #tpu.pipeline_mode<synchronous>, transform_indices = @transform_3, window_bounds = array<i64: 1, 32>}, {pipeline_mode = #tpu.pipeline_mode<synchronous>, transform_indices = @transform_4, window_bounds = array<i64: 32, 64>}, {pipeline_mode = #tpu.pipeline_mode<synchronous>, transform_indices = @transform_5, window_bounds = array<i64: 1, 64>}, {pipeline_mode = #tpu.pipeline_mode<synchronous>, transform_indices = @transform_6, window_bounds = array<i64: 32, 32>}, {pipeline_mode = #tpu.pipeline_mode<synchronous>, transform_indices = @transform_7, window_bounds = array<i64: 1, 32>}, {pipeline_mode = #tpu.pipeline_mode<synchronous>, transform_indices = @transform_8, window_bounds = array<i64: 32, 64>}, {pipeline_mode = #tpu.pipeline_mode<synchronous>, transform_indices = @transform_9, window_bounds = array<i64: 1, 64>}, {pipeline_mode = #tpu.pipeline_mode<synchronous>, transform_indices = @transform_10, window_bounds = array<i64: 64, 32>}, {pipeline_mode = #tpu.pipeline_mode<synchronous>, transform_indices = @transform_11, window_bounds = array<i64: 1, 32>}, {pipeline_mode = #tpu.pipeline_mode<synchronous>, transform_indices = @transform_12, window_bounds = array<i64: 1, 32>}, {pipeline_mode = #tpu.pipeline_mode<synchronous>, transform_indices = @transform_13, window_bounds = array<i64: 1, 32>}, {pipeline_mode = #tpu.pipeline_mode<synchronous>, transform_indices = @transform_14, window_bounds = array<i64: 1, 32>}, {pipeline_mode = #tpu.pipeline_mode<synchronous>, transform_indices = @transform_15, window_bounds = array<i64: 1, 32>}, {transform_indices = @transform_16, window_bounds = array<i64: 1, 8, 32>}]} {
    %c0 = arith.constant 0 : index
    %c0_0 = arith.constant 0 : index
    %c0_1 = arith.constant 0 : index
    %0 = vector.load %arg2[%c0, %c0_0, %c0_1] : memref<1x8x32xf32, #tpu.memory_space<vmem>>, vector<1x8x32xf32>
    %1 = vector.shape_cast %0 : vector<1x8x32xf32> to vector<8x32xf32>
    %c0_i32 = arith.constant 0 : i32
    %2 = arith.cmpi eq, %arg1, %c0_i32 : i32
    %3 = arith.extui %2 : i1 to i32
    %c0_i32_2 = arith.constant 0 : i32
    %4 = arith.cmpi ne, %3, %c0_i32_2 : i32
    scf.if %4 {
      %c0_73 = arith.constant 0 : index
      %c0_74 = arith.constant 0 : index
      %c0_75 = arith.constant 0 : index
      %157 = vector.load %arg3[%c0_73, %c0_74, %c0_75] : memref<1x8x32xf32, #tpu.memory_space<vmem>>, vector<1x8x32xf32>
      %158 = vector.shape_cast %157 : vector<1x8x32xf32> to vector<8x32xf32>
      %c0_76 = arith.constant 0 : index
      %c0_77 = arith.constant 0 : index
      %159 = vector.load %arg6[%c0_76, %c0_77] : memref<32x64xf32, #tpu.memory_space<vmem>>, vector<32x64xf32>
      %cst_78 = arith.constant dense<0.000000e+00> : vector<8x64xf32>
      %160 = tpu.matmul %158, %159, %cst_78 {dimension_numbers = #tpu.dot_dimension_numbers<[1], [0], [0], [1], [0, 0, 1, 1], [], []>} : vector<8x32xf32>, vector<32x64xf32>, vector<8x64xf32> -> vector<8x64xf32>
      %c0_79 = arith.constant 0 : index
      %c0_80 = arith.constant 0 : index
      %161 = vector.load %arg7[%c0_79, %c0_80] : memref<1x64xf32, #tpu.memory_space<vmem>>, vector<1x64xf32>
      %162 = vector.broadcast %161 : vector<1x64xf32> to vector<8x64xf32>
      %163 = arith.addf %160, %162 : vector<8x64xf32>
      %164 = vector.extract_strided_slice %163 {offsets = [0, 0], sizes = [8, 32], strides = [1, 1]} : vector<8x64xf32> to vector<8x32xf32>
      %c0_81 = arith.constant 0 : index
      %c0_82 = arith.constant 0 : index
      %c0_83 = arith.constant 0 : index
      %165 = vector.load %arg19[%c0_81, %c0_82, %c0_83] : memref<2x8x32xf32, #tpu.memory_space<vmem>>, vector<1x8x32xf32>
      %166 = vector.shape_cast %165 : vector<1x8x32xf32> to vector<8x32xf32>
      %167 = vector.shape_cast %164 : vector<8x32xf32> to vector<1x8x32xf32>
      tpu.vector_store %arg19[%c0_81, %c0_82, %c0_83], %167 {strides = array<i32>} : memref<2x8x32xf32, #tpu.memory_space<vmem>>, vector<1x8x32xf32>,
      %168 = vector.extract_strided_slice %163 {offsets = [0, 32], sizes = [8, 32], strides = [1, 1]} : vector<8x64xf32> to vector<8x32xf32>
      %c1_84 = arith.constant 1 : index
      %c0_85 = arith.constant 0 : index
      %c0_86 = arith.constant 0 : index
      %169 = vector.load %arg19[%c1_84, %c0_85, %c0_86] : memref<2x8x32xf32, #tpu.memory_space<vmem>>, vector<1x8x32xf32>
      %170 = vector.shape_cast %169 : vector<1x8x32xf32> to vector<8x32xf32>
      %171 = vector.shape_cast %168 : vector<8x32xf32> to vector<1x8x32xf32>
      tpu.vector_store %arg19[%c1_84, %c0_85, %c0_86], %171 {strides = array<i32>} : memref<2x8x32xf32, #tpu.memory_space<vmem>>, vector<1x8x32xf32>,
    } else {
    }
    %c0_3 = arith.constant 0 : index
    %c0_4 = arith.constant 0 : index
    %5 = vector.load %arg4[%c0_3, %c0_4] : memref<32x32xf32, #tpu.memory_space<vmem>>, vector<32x32xf32>
    %cst = arith.constant dense<0.000000e+00> : vector<8x32xf32>
    %6 = tpu.matmul %1, %5, %cst {dimension_numbers = #tpu.dot_dimension_numbers<[1], [0], [0], [1], [0, 0, 1, 1], [], []>} : vector<8x32xf32>, vector<32x32xf32>, vector<8x32xf32> -> vector<8x32xf32>
    %c0_5 = arith.constant 0 : index
    %c0_6 = arith.constant 0 : index
    %7 = vector.load %arg5[%c0_5, %c0_6] : memref<1x32xf32, #tpu.memory_space<vmem>>, vector<1x32xf32>
    %8 = vector.broadcast %7 : vector<1x32xf32> to vector<8x32xf32>
    %9 = arith.addf %6, %8 : vector<8x32xf32>
    %cst_7 = arith.constant 0.353553385 : f32
    %10 = vector.broadcast %cst_7 : f32 to vector<8x32xf32>
    %11 = arith.mulf %9, %10 : vector<8x32xf32>
    %c0_8 = arith.constant 0 : index
    %c0_9 = arith.constant 0 : index
    %c0_10 = arith.constant 0 : index
    %12 = vector.load %arg19[%c0_8, %c0_9, %c0_10] : memref<2x8x32xf32, #tpu.memory_space<vmem>>, vector<1x8x32xf32>
    %13 = vector.shape_cast %12 : vector<1x8x32xf32> to vector<8x32xf32>
    %c1 = arith.constant 1 : index
    %c0_11 = arith.constant 0 : index
    %c0_12 = arith.constant 0 : index
    %14 = vector.load %arg19[%c1, %c0_11, %c0_12] : memref<2x8x32xf32, #tpu.memory_space<vmem>>, vector<1x8x32xf32>
    %15 = vector.shape_cast %14 : vector<1x8x32xf32> to vector<8x32xf32>
    %cst_13 = arith.constant 0.000000e+00 : f32
    %16 = vector.broadcast %cst_13 : f32 to vector<8x32xf32>
    %17 = vector.extract_strided_slice %11 {offsets = [0, 0], sizes = [8, 8], strides = [1, 1]} : vector<8x32xf32> to vector<8x8xf32>
    %18 = vector.extract_strided_slice %13 {offsets = [0, 0], sizes = [8, 8], strides = [1, 1]} : vector<8x32xf32> to vector<8x8xf32>
    %19 = vector.extract_strided_slice %15 {offsets = [0, 0], sizes = [8, 8], strides = [1, 1]} : vector<8x32xf32> to vector<8x8xf32>
    %cst_14 = arith.constant dense<0.000000e+00> : vector<8x8xf32>
    %20 = tpu.matmul %17, %18, %cst_14 {dimension_numbers = #tpu.dot_dimension_numbers<[1], [1], [0], [0], [0, 0, 1, 0], [], []>} : vector<8x8xf32>, vector<8x8xf32>, vector<8x8xf32> -> vector<8x8xf32>
    %cst_15 = arith.constant dense<0xFF800000> : vector<8xf32>
    %21 = vector.multi_reduction <maximumf>, %20, %cst_15 [1] : vector<8x8xf32> to vector<8xf32>
    %22 = vector.shape_cast %21 : vector<8xf32> to vector<8x1xf32>
    %23 = vector.broadcast %22 : vector<8x1xf32> to vector<8x8xf32>
    %24 = arith.subf %20, %23 : vector<8x8xf32>
    %25 = math.exp %24 : vector<8x8xf32>
    %cst_16 = arith.constant dense<0.000000e+00> : vector<8xf32>
    %26 = vector.multi_reduction <add>, %25, %cst_16 [1] : vector<8x8xf32> to vector<8xf32>
    %27 = vector.shape_cast %26 : vector<8xf32> to vector<8x1xf32>
    %28 = tpu.reciprocal %27 : vector<8x1xf32> -> vector<8x1xf32>
    %29 = vector.broadcast %28 : vector<8x1xf32> to vector<8x8xf32>
    %30 = arith.mulf %25, %29 : vector<8x8xf32>
    %cst_17 = arith.constant dense<0.000000e+00> : vector<8x8xf32>
    %31 = tpu.matmul %30, %19, %cst_17 {dimension_numbers = #tpu.dot_dimension_numbers<[1], [0], [0], [1], [0, 0, 1, 1], [], []>} : vector<8x8xf32>, vector<8x8xf32>, vector<8x8xf32> -> vector<8x8xf32>
    %c0_18 = arith.constant 0 : index
    %c0_19 = arith.constant 0 : index
    %32 = vector.load %arg8[%c0_18, %c0_19] : memref<32x32xf32, #tpu.memory_space<vmem>>, vector<8x32xf32>
    %cst_20 = arith.constant dense<0.000000e+00> : vector<8x32xf32>
    %33 = tpu.matmul %31, %32, %cst_20 {dimension_numbers = #tpu.dot_dimension_numbers<[1], [0], [0], [1], [0, 0, 1, 1], [], []>} : vector<8x8xf32>, vector<8x32xf32>, vector<8x32xf32> -> vector<8x32xf32>
    %34 = arith.addf %16, %33 : vector<8x32xf32>
    %35 = vector.extract_strided_slice %11 {offsets = [0, 8], sizes = [8, 8], strides = [1, 1]} : vector<8x32xf32> to vector<8x8xf32>
    %36 = vector.extract_strided_slice %13 {offsets = [0, 8], sizes = [8, 8], strides = [1, 1]} : vector<8x32xf32> to vector<8x8xf32>
    %37 = vector.extract_strided_slice %15 {offsets = [0, 8], sizes = [8, 8], strides = [1, 1]} : vector<8x32xf32> to vector<8x8xf32>
    %cst_21 = arith.constant dense<0.000000e+00> : vector<8x8xf32>
    %38 = tpu.matmul %35, %36, %cst_21 {dimension_numbers = #tpu.dot_dimension_numbers<[1], [1], [0], [0], [0, 0, 1, 0], [], []>} : vector<8x8xf32>, vector<8x8xf32>, vector<8x8xf32> -> vector<8x8xf32>
    %cst_22 = arith.constant dense<0xFF800000> : vector<8xf32>
    %39 = vector.multi_reduction <maximumf>, %38, %cst_22 [1] : vector<8x8xf32> to vector<8xf32>
    %40 = vector.shape_cast %39 : vector<8xf32> to vector<8x1xf32>
    %41 = vector.broadcast %40 : vector<8x1xf32> to vector<8x8xf32>
    %42 = arith.subf %38, %41 : vector<8x8xf32>
    %43 = math.exp %42 : vector<8x8xf32>
    %cst_23 = arith.constant dense<0.000000e+00> : vector<8xf32>
    %44 = vector.multi_reduction <add>, %43, %cst_23 [1] : vector<8x8xf32> to vector<8xf32>
    %45 = vector.shape_cast %44 : vector<8xf32> to vector<8x1xf32>
    %46 = tpu.reciprocal %45 : vector<8x1xf32> -> vector<8x1xf32>
    %47 = vector.broadcast %46 : vector<8x1xf32> to vector<8x8xf32>
    %48 = arith.mulf %43, %47 : vector<8x8xf32>
    %cst_24 = arith.constant dense<0.000000e+00> : vector<8x8xf32>
    %49 = tpu.matmul %48, %37, %cst_24 {dimension_numbers = #tpu.dot_dimension_numbers<[1], [0], [0], [1], [0, 0, 1, 1], [], []>} : vector<8x8xf32>, vector<8x8xf32>, vector<8x8xf32> -> vector<8x8xf32>
    %c8 = arith.constant 8 : index
    %c0_25 = arith.constant 0 : index
    %50 = vector.load %arg8[%c8, %c0_25] : memref<32x32xf32, #tpu.memory_space<vmem>>, vector<8x32xf32>
    %cst_26 = arith.constant dense<0.000000e+00> : vector<8x32xf32>
    %51 = tpu.matmul %49, %50, %cst_26 {dimension_numbers = #tpu.dot_dimension_numbers<[1], [0], [0], [1], [0, 0, 1, 1], [], []>} : vector<8x8xf32>, vector<8x32xf32>, vector<8x32xf32> -> vector<8x32xf32>
    %52 = arith.addf %34, %51 : vector<8x32xf32>
    %53 = vector.extract_strided_slice %11 {offsets = [0, 16], sizes = [8, 8], strides = [1, 1]} : vector<8x32xf32> to vector<8x8xf32>
    %54 = vector.extract_strided_slice %13 {offsets = [0, 16], sizes = [8, 8], strides = [1, 1]} : vector<8x32xf32> to vector<8x8xf32>
    %55 = vector.extract_strided_slice %15 {offsets = [0, 16], sizes = [8, 8], strides = [1, 1]} : vector<8x32xf32> to vector<8x8xf32>
    %cst_27 = arith.constant dense<0.000000e+00> : vector<8x8xf32>
    %56 = tpu.matmul %53, %54, %cst_27 {dimension_numbers = #tpu.dot_dimension_numbers<[1], [1], [0], [0], [0, 0, 1, 0], [], []>} : vector<8x8xf32>, vector<8x8xf32>, vector<8x8xf32> -> vector<8x8xf32>
    %cst_28 = arith.constant dense<0xFF800000> : vector<8xf32>
    %57 = vector.multi_reduction <maximumf>, %56, %cst_28 [1] : vector<8x8xf32> to vector<8xf32>
    %58 = vector.shape_cast %57 : vector<8xf32> to vector<8x1xf32>
    %59 = vector.broadcast %58 : vector<8x1xf32> to vector<8x8xf32>
    %60 = arith.subf %56, %59 : vector<8x8xf32>
    %61 = math.exp %60 : vector<8x8xf32>
    %cst_29 = arith.constant dense<0.000000e+00> : vector<8xf32>
    %62 = vector.multi_reduction <add>, %61, %cst_29 [1] : vector<8x8xf32> to vector<8xf32>
    %63 = vector.shape_cast %62 : vector<8xf32> to vector<8x1xf32>
    %64 = tpu.reciprocal %63 : vector<8x1xf32> -> vector<8x1xf32>
    %65 = vector.broadcast %64 : vector<8x1xf32> to vector<8x8xf32>
    %66 = arith.mulf %61, %65 : vector<8x8xf32>
    %cst_30 = arith.constant dense<0.000000e+00> : vector<8x8xf32>
    %67 = tpu.matmul %66, %55, %cst_30 {dimension_numbers = #tpu.dot_dimension_numbers<[1], [0], [0], [1], [0, 0, 1, 1], [], []>} : vector<8x8xf32>, vector<8x8xf32>, vector<8x8xf32> -> vector<8x8xf32>
    %c16 = arith.constant 16 : index
    %c0_31 = arith.constant 0 : index
    %68 = vector.load %arg8[%c16, %c0_31] : memref<32x32xf32, #tpu.memory_space<vmem>>, vector<8x32xf32>
    %cst_32 = arith.constant dense<0.000000e+00> : vector<8x32xf32>
    %69 = tpu.matmul %67, %68, %cst_32 {dimension_numbers = #tpu.dot_dimension_numbers<[1], [0], [0], [1], [0, 0, 1, 1], [], []>} : vector<8x8xf32>, vector<8x32xf32>, vector<8x32xf32> -> vector<8x32xf32>
    %70 = arith.addf %52, %69 : vector<8x32xf32>
    %71 = vector.extract_strided_slice %11 {offsets = [0, 24], sizes = [8, 8], strides = [1, 1]} : vector<8x32xf32> to vector<8x8xf32>
    %72 = vector.extract_strided_slice %13 {offsets = [0, 24], sizes = [8, 8], strides = [1, 1]} : vector<8x32xf32> to vector<8x8xf32>
    %73 = vector.extract_strided_slice %15 {offsets = [0, 24], sizes = [8, 8], strides = [1, 1]} : vector<8x32xf32> to vector<8x8xf32>
    %cst_33 = arith.constant dense<0.000000e+00> : vector<8x8xf32>
    %74 = tpu.matmul %71, %72, %cst_33 {dimension_numbers = #tpu.dot_dimension_numbers<[1], [1], [0], [0], [0, 0, 1, 0], [], []>} : vector<8x8xf32>, vector<8x8xf32>, vector<8x8xf32> -> vector<8x8xf32>
    %cst_34 = arith.constant dense<0xFF800000> : vector<8xf32>
    %75 = vector.multi_reduction <maximumf>, %74, %cst_34 [1] : vector<8x8xf32> to vector<8xf32>
    %76 = vector.shape_cast %75 : vector<8xf32> to vector<8x1xf32>
    %77 = vector.broadcast %76 : vector<8x1xf32> to vector<8x8xf32>
    %78 = arith.subf %74, %77 : vector<8x8xf32>
    %79 = math.exp %78 : vector<8x8xf32>
    %cst_35 = arith.constant dense<0.000000e+00> : vector<8xf32>
    %80 = vector.multi_reduction <add>, %79, %cst_35 [1] : vector<8x8xf32> to vector<8xf32>
    %81 = vector.shape_cast %80 : vector<8xf32> to vector<8x1xf32>
    %82 = tpu.reciprocal %81 : vector<8x1xf32> -> vector<8x1xf32>
    %83 = vector.broadcast %82 : vector<8x1xf32> to vector<8x8xf32>
    %84 = arith.mulf %79, %83 : vector<8x8xf32>
    %cst_36 = arith.constant dense<0.000000e+00> : vector<8x8xf32>
    %85 = tpu.matmul %84, %73, %cst_36 {dimension_numbers = #tpu.dot_dimension_numbers<[1], [0], [0], [1], [0, 0, 1, 1], [], []>} : vector<8x8xf32>, vector<8x8xf32>, vector<8x8xf32> -> vector<8x8xf32>
    %c24 = arith.constant 24 : index
    %c0_37 = arith.constant 0 : index
    %86 = vector.load %arg8[%c24, %c0_37] : memref<32x32xf32, #tpu.memory_space<vmem>>, vector<8x32xf32>
    %cst_38 = arith.constant dense<0.000000e+00> : vector<8x32xf32>
    %87 = tpu.matmul %85, %86, %cst_38 {dimension_numbers = #tpu.dot_dimension_numbers<[1], [0], [0], [1], [0, 0, 1, 1], [], []>} : vector<8x8xf32>, vector<8x32xf32>, vector<8x32xf32> -> vector<8x32xf32>
    %88 = arith.addf %70, %87 : vector<8x32xf32>
    %c0_39 = arith.constant 0 : index
    %c0_40 = arith.constant 0 : index
    %89 = vector.load %arg9[%c0_39, %c0_40] : memref<1x32xf32, #tpu.memory_space<vmem>>, vector<1x32xf32>
    %90 = vector.broadcast %89 : vector<1x32xf32> to vector<8x32xf32>
    %91 = arith.addf %88, %90 : vector<8x32xf32>
    %92 = arith.addf %1, %91 : vector<8x32xf32>
    %cst_41 = arith.constant dense<0.000000e+00> : vector<8xf32>
    %93 = vector.multi_reduction <add>, %92, %cst_41 [1] : vector<8x32xf32> to vector<8xf32>
    %94 = vector.shape_cast %93 : vector<8xf32> to vector<8x1xf32>
    %cst_42 = arith.constant 3.200000e+01 : f32
    %95 = vector.broadcast %cst_42 : f32 to vector<8x1xf32>
    %96 = arith.divf %94, %95 : vector<8x1xf32>
    %97 = vector.broadcast %96 : vector<8x1xf32> to vector<8x32xf32>
    %98 = arith.subf %92, %97 : vector<8x32xf32>
    %99 = arith.mulf %98, %98 : vector<8x32xf32>
    %cst_43 = arith.constant dense<0.000000e+00> : vector<8xf32>
    %100 = vector.multi_reduction <add>, %99, %cst_43 [1] : vector<8x32xf32> to vector<8xf32>
    %101 = vector.shape_cast %100 : vector<8xf32> to vector<8x1xf32>
    %cst_44 = arith.constant 3.200000e+01 : f32
    %102 = vector.broadcast %cst_44 : f32 to vector<8x1xf32>
    %103 = arith.divf %101, %102 : vector<8x1xf32>
    %104 = vector.broadcast %96 : vector<8x1xf32> to vector<8x32xf32>
    %105 = arith.subf %92, %104 : vector<8x32xf32>
    %cst_45 = arith.constant 9.99999974E-6 : f32
    %106 = vector.broadcast %cst_45 : f32 to vector<8x1xf32>
    %107 = arith.addf %103, %106 : vector<8x1xf32>
    %108 = math.rsqrt %107 : vector<8x1xf32>
    %109 = vector.broadcast %108 : vector<8x1xf32> to vector<8x32xf32>
    %110 = arith.mulf %105, %109 : vector<8x32xf32>
    %c0_46 = arith.constant 0 : index
    %c0_47 = arith.constant 0 : index
    %111 = vector.load %arg14[%c0_46, %c0_47] : memref<1x32xf32, #tpu.memory_space<vmem>>, vector<1x32xf32>
    %112 = vector.broadcast %111 : vector<1x32xf32> to vector<8x32xf32>
    %113 = arith.mulf %110, %112 : vector<8x32xf32>
    %c0_48 = arith.constant 0 : index
    %c0_49 = arith.constant 0 : index
    %114 = vector.load %arg15[%c0_48, %c0_49] : memref<1x32xf32, #tpu.memory_space<vmem>>, vector<1x32xf32>
    %115 = vector.broadcast %114 : vector<1x32xf32> to vector<8x32xf32>
    %116 = arith.addf %113, %115 : vector<8x32xf32>
    %c0_50 = arith.constant 0 : index
    %c0_51 = arith.constant 0 : index
    %117 = vector.load %arg10[%c0_50, %c0_51] : memref<32x64xf32, #tpu.memory_space<vmem>>, vector<32x64xf32>
    %cst_52 = arith.constant dense<0.000000e+00> : vector<8x64xf32>
    %118 = tpu.matmul %116, %117, %cst_52 {dimension_numbers = #tpu.dot_dimension_numbers<[1], [0], [0], [1], [0, 0, 1, 1], [], []>} : vector<8x32xf32>, vector<32x64xf32>, vector<8x64xf32> -> vector<8x64xf32>
    %c0_53 = arith.constant 0 : index
    %c0_54 = arith.constant 0 : index
    %119 = vector.load %arg11[%c0_53, %c0_54] : memref<1x64xf32, #tpu.memory_space<vmem>>, vector<1x64xf32>
    %120 = vector.broadcast %119 : vector<1x64xf32> to vector<8x64xf32>
    %121 = arith.addf %118, %120 : vector<8x64xf32>
    %cst_55 = arith.constant 0.000000e+00 : f32
    %122 = vector.broadcast %cst_55 : f32 to vector<8x64xf32>
    %123 = arith.maximumf %121, %122 : vector<8x64xf32>
    %c0_56 = arith.constant 0 : index
    %c0_57 = arith.constant 0 : index
    %124 = vector.load %arg12[%c0_56, %c0_57] : memref<64x32xf32, #tpu.memory_space<vmem>>, vector<64x32xf32>
    %cst_58 = arith.constant dense<0.000000e+00> : vector<8x32xf32>
    %125 = tpu.matmul %123, %124, %cst_58 {dimension_numbers = #tpu.dot_dimension_numbers<[1], [0], [0], [1], [0, 0, 1, 1], [], []>} : vector<8x64xf32>, vector<64x32xf32>, vector<8x32xf32> -> vector<8x32xf32>
    %c0_59 = arith.constant 0 : index
    %c0_60 = arith.constant 0 : index
    %126 = vector.load %arg13[%c0_59, %c0_60] : memref<1x32xf32, #tpu.memory_space<vmem>>, vector<1x32xf32>
    %127 = vector.broadcast %126 : vector<1x32xf32> to vector<8x32xf32>
    %128 = arith.addf %125, %127 : vector<8x32xf32>
    %129 = arith.addf %116, %128 : vector<8x32xf32>
    %cst_61 = arith.constant dense<0.000000e+00> : vector<8xf32>
    %130 = vector.multi_reduction <add>, %129, %cst_61 [1] : vector<8x32xf32> to vector<8xf32>
    %131 = vector.shape_cast %130 : vector<8xf32> to vector<8x1xf32>
    %cst_62 = arith.constant 3.200000e+01 : f32
    %132 = vector.broadcast %cst_62 : f32 to vector<8x1xf32>
    %133 = arith.divf %131, %132 : vector<8x1xf32>
    %134 = vector.broadcast %133 : vector<8x1xf32> to vector<8x32xf32>
    %135 = arith.subf %129, %134 : vector<8x32xf32>
    %136 = arith.mulf %135, %135 : vector<8x32xf32>
    %cst_63 = arith.constant dense<0.000000e+00> : vector<8xf32>
    %137 = vector.multi_reduction <add>, %136, %cst_63 [1] : vector<8x32xf32> to vector<8xf32>
    %138 = vector.shape_cast %137 : vector<8xf32> to vector<8x1xf32>
    %cst_64 = arith.constant 3.200000e+01 : f32
    %139 = vector.broadcast %cst_64 : f32 to vector<8x1xf32>
    %140 = arith.divf %138, %139 : vector<8x1xf32>
    %141 = vector.broadcast %133 : vector<8x1xf32> to vector<8x32xf32>
    %142 = arith.subf %129, %141 : vector<8x32xf32>
    %cst_65 = arith.constant 9.99999974E-6 : f32
    %143 = vector.broadcast %cst_65 : f32 to vector<8x1xf32>
    %144 = arith.addf %140, %143 : vector<8x1xf32>
    %145 = math.rsqrt %144 : vector<8x1xf32>
    %146 = vector.broadcast %145 : vector<8x1xf32> to vector<8x32xf32>
    %147 = arith.mulf %142, %146 : vector<8x32xf32>
    %c0_66 = arith.constant 0 : index
    %c0_67 = arith.constant 0 : index
    %148 = vector.load %arg16[%c0_66, %c0_67] : memref<1x32xf32, #tpu.memory_space<vmem>>, vector<1x32xf32>
    %149 = vector.broadcast %148 : vector<1x32xf32> to vector<8x32xf32>
    %150 = arith.mulf %147, %149 : vector<8x32xf32>
    %c0_68 = arith.constant 0 : index
    %c0_69 = arith.constant 0 : index
    %151 = vector.load %arg17[%c0_68, %c0_69] : memref<1x32xf32, #tpu.memory_space<vmem>>, vector<1x32xf32>
    %152 = vector.broadcast %151 : vector<1x32xf32> to vector<8x32xf32>
    %153 = arith.addf %150, %152 : vector<8x32xf32>
    %c0_70 = arith.constant 0 : index
    %c0_71 = arith.constant 0 : index
    %c0_72 = arith.constant 0 : index
    %154 = vector.load %arg18[%c0_70, %c0_71, %c0_72] : memref<1x8x32xf32, #tpu.memory_space<vmem>>, vector<1x8x32xf32>
    %155 = vector.shape_cast %154 : vector<1x8x32xf32> to vector<8x32xf32>
    %156 = vector.shape_cast %153 : vector<8x32xf32> to vector<1x8x32xf32>
    tpu.vector_store %arg18[%c0_70, %c0_71, %c0_72], %156 {strides = array<i32>} : memref<1x8x32xf32, #tpu.memory_space<vmem>>, vector<1x8x32xf32>,
    return
  }
  func.func @transform_0(%arg0: i32, %arg1: i32) -> (i32, i32, i32) {
    %c0_i32 = arith.constant 0 : i32
    %c0_i32_0 = arith.constant 0 : i32
    return %arg0, %arg1, %c0_i32 : i32, i32, i32
  }
  func.func @transform_1(%arg0: i32, %arg1: i32) -> (i32, i32, i32) {
    %c0_i32 = arith.constant 0 : i32
    %c0_i32_0 = arith.constant 0 : i32
    %c0_i32_1 = arith.constant 0 : i32
    return %arg0, %c0_i32, %c0_i32_0 : i32, i32, i32
  }
  func.func @transform_2(%arg0: i32, %arg1: i32) -> (i32, i32) {
    %c0_i32 = arith.constant 0 : i32
    %c0_i32_0 = arith.constant 0 : i32
    %c0_i32_1 = arith.constant 0 : i32
    return %c0_i32, %c0_i32_0 : i32, i32
  }
  func.func @transform_3(%arg0: i32, %arg1: i32) -> (i32, i32) {
    %c0_i32 = arith.constant 0 : i32
    %c0_i32_0 = arith.constant 0 : i32
    %c0_i32_1 = arith.constant 0 : i32
    return %c0_i32, %c0_i32_0 : i32, i32
  }
  func.func @transform_4(%arg0: i32, %arg1: i32) -> (i32, i32) {
    %c0_i32 = arith.constant 0 : i32
    %c0_i32_0 = arith.constant 0 : i32
    %c0_i32_1 = arith.constant 0 : i32
    return %c0_i32, %c0_i32_0 : i32, i32
  }
  func.func @transform_5(%arg0: i32, %arg1: i32) -> (i32, i32) {
    %c0_i32 = arith.constant 0 : i32
    %c0_i32_0 = arith.constant 0 : i32
    %c0_i32_1 = arith.constant 0 : i32
    return %c0_i32, %c0_i32_0 : i32, i32
  }
  func.func @transform_6(%arg0: i32, %arg1: i32) -> (i32, i32) {
    %c0_i32 = arith.constant 0 : i32
    %c0_i32_0 = arith.constant 0 : i32
    %c0_i32_1 = arith.constant 0 : i32
    return %c0_i32, %c0_i32_0 : i32, i32
  }
  func.func @transform_7(%arg0: i32, %arg1: i32) -> (i32, i32) {
    %c0_i32 = arith.constant 0 : i32
    %c0_i32_0 = arith.constant 0 : i32
    %c0_i32_1 = arith.constant 0 : i32
    return %c0_i32, %c0_i32_0 : i32, i32
  }
  func.func @transform_8(%arg0: i32, %arg1: i32) -> (i32, i32) {
    %c0_i32 = arith.constant 0 : i32
    %c0_i32_0 = arith.constant 0 : i32
    %c0_i32_1 = arith.constant 0 : i32
    return %c0_i32, %c0_i32_0 : i32, i32
  }
  func.func @transform_9(%arg0: i32, %arg1: i32) -> (i32, i32) {
    %c0_i32 = arith.constant 0 : i32
    %c0_i32_0 = arith.constant 0 : i32
    %c0_i32_1 = arith.constant 0 : i32
    return %c0_i32, %c0_i32_0 : i32, i32
  }
  func.func @transform_10(%arg0: i32, %arg1: i32) -> (i32, i32) {
    %c0_i32 = arith.constant 0 : i32
    %c0_i32_0 = arith.constant 0 : i32
    %c0_i32_1 = arith.constant 0 : i32
    return %c0_i32, %c0_i32_0 : i32, i32
  }
  func.func @transform_11(%arg0: i32, %arg1: i32) -> (i32, i32) {
    %c0_i32 = arith.constant 0 : i32
    %c0_i32_0 = arith.constant 0 : i32
    %c0_i32_1 = arith.constant 0 : i32
    return %c0_i32, %c0_i32_0 : i32, i32
  }
  func.func @transform_12(%arg0: i32, %arg1: i32) -> (i32, i32) {
    %c0_i32 = arith.constant 0 : i32
    %c0_i32_0 = arith.constant 0 : i32
    %c0_i32_1 = arith.constant 0 : i32
    return %c0_i32, %c0_i32_0 : i32, i32
  }
  func.func @transform_13(%arg0: i32, %arg1: i32) -> (i32, i32) {
    %c0_i32 = arith.constant 0 : i32
    %c0_i32_0 = arith.constant 0 : i32
    %c0_i32_1 = arith.constant 0 : i32
    return %c0_i32, %c0_i32_0 : i32, i32
  }
  func.func @transform_14(%arg0: i32, %arg1: i32) -> (i32, i32) {
    %c0_i32 = arith.constant 0 : i32
    %c0_i32_0 = arith.constant 0 : i32
    %c0_i32_1 = arith.constant 0 : i32
    return %c0_i32, %c0_i32_0 : i32, i32
  }
  func.func @transform_15(%arg0: i32, %arg1: i32) -> (i32, i32) {
    %c0_i32 = arith.constant 0 : i32
    %c0_i32_0 = arith.constant 0 : i32
    %c0_i32_1 = arith.constant 0 : i32
    return %c0_i32, %c0_i32_0 : i32, i32
  }
  func.func @transform_16(%arg0: i32, %arg1: i32) -> (i32, i32, i32) {
    %c0_i32 = arith.constant 0 : i32
    %c0_i32_0 = arith.constant 0 : i32
    return %arg0, %arg1, %c0_i32 : i32, i32, i32
  }
}

</mosaic_0001>

<bundles_post_ra>
// kernel: tpu_custom_call.1
= control target key start
LH: loop header
LB: loop body
LE: loop exit
PB: predicated region body
PF: predicated region fallthrough
CT: control target
= control target key end

     0   :  { %s3106_s0 = inlined_call_operand.hbm [shape: f32[2,8,32], index: 0, kind: input, shape index: {}]   ;;  %s3107_s1 = inlined_call_operand.hbm [shape: f32[2,8,32], index: 1, kind: input, shape index: {}]   ;;  %s3108_s2 = inlined_call_operand.vmem [shape: f32[32,32], index: 2, kind: input, shape index: {}]   ;;  %s3109_s3 = inlined_call_operand.vmem [shape: f32[1,32], index: 3, kind: input, shape index: {}]   ;;  %s3110_s4 = inlined_call_operand.vmem [shape: f32[32,64], index: 4, kind: input, shape index: {}]   ;;  %s3111_s5 = inlined_call_operand.vmem [shape: f32[1,64], index: 5, kind: input, shape index: {}]   ;;  %s3112_s6 = inlined_call_operand.vmem [shape: f32[32,32], index: 6, kind: input, shape index: {}]   ;;  %s3113_s7 = inlined_call_operand.vmem [shape: f32[1,32], index: 7, kind: input, shape index: {}]   ;;  %s3114_s8 = inlined_call_operand.hbm [shape: f32[32,64], index: 8, kind: input, shape index: {}]   ;;  %s3115_s9 = inlined_call_operand.vmem [shape: f32[1,64], index: 9, kind: input, shape index: {}]   ;;  %s3116_s10 = inlined_call_operand.vmem [shape: f32[64,32], index: 10, kind: input, shape index: {}]   ;;  %s3117_s11 = inlined_call_operand.vmem [shape: f32[1,32], index: 11, kind: input, shape index: {}]   ;;  %s3118_s12 = inlined_call_operand.vmem [shape: f32[1,32], index: 12, kind: input, shape index: {}]   ;;  %s3119_s13 = inlined_call_operand.vmem [shape: f32[1,32], index: 13, kind: input, shape index: {}]   ;;  %s3120_s14 = inlined_call_operand.vmem [shape: f32[1,32], index: 14, kind: input, shape index: {}]   ;;  %s3121_s15 = inlined_call_operand.vmem [shape: f32[1,32], index: 15, kind: input, shape index: {}]   ;;  %s3122_s16 = inlined_call_operand.hbm [shape: f32[2,8,32], index: 16, kind: output, shape index: {}]  }
   0x1   :  { %3130 = sst [smem:[#allocation20_spill]] %s3106_s0 }
   0x2   :  { %3131 = sst [smem:[#allocation21_spill]] %s3114_s8 }
   0x3   :  { %3132 = sst [smem:[#allocation22_spill]] %s3115_s9 }
   0x4   :  { %3133 = sst [smem:[#allocation23_spill]] %s3117_s11 }
   0x5   :  { %3134 = sst [smem:[#allocation24_spill]] %s3118_s12 }
   0x6   :  { %3135 = sst [smem:[#allocation25_spill]] %s3119_s13 }
   0x7   :  { %3136 = sst [smem:[#allocation26_spill]] %s3120_s14 }
   0x8   :  { %3137 = sst [smem:[#allocation27_spill]] %s3121_s15 }
   0x9   :  { %3138 = sst [smem:[#allocation28_spill]] %s3122_s16 }
   0xa   :  { %21 = vsyncpa [#allocation4], 0 }
   0xb   :  { %23 = vsyncpa [#allocation4 + $0x1], 0 }
   0xc   :  { %24 = vsyncpa [#allocation7], 0 }
   0xd   :  { %26 = vsyncpa [#allocation7 + $0x1], 0 }
   0xe   :  { %27 = vsyncpa [#allocation5], 0 }
   0xf   :  { %29 = vsyncpa [#allocation5 + $0x1], 0  ;;  %s2700_s21 = smov 0   ;;  %s2702_s22 = smov 0  }
  0x10   :  { %s2704_s23 = smov 0   ;;  %s2706_s24 = smov 0  }
  0x11   :  { %s2708_s25 = smov 0   ;;  %s2710_s26 = smov 0  }
  0x12 LB: > { %3139 = sst [smem:[#allocation14_spill]] %s2581_s21  ;;  %s2731_s27 = sadd.s32 4294967295, %s2601_s26   ;;  %s2601_s26 = sphi %s2710_s26, %s35_s26   ;;  %s2597_s25 = sphi %s2708_s25, %s3169_s25   ;;  %s2593_s24 = sphi %s2706_s24, %s3168_s24   ;;  %s2589_s23 = sphi %s2704_s23, %s3172_s23   ;;  %s2585_s22 = sphi %s2702_s22, %s3171_s22   ;;  %s2581_s21 = sphi %s2700_s21, %s3170_s21  }
  0x13   : > { %3140 = sst [smem:[#allocation15_spill]] %s2593_s24  ;;  %s2119_s28 = sadd.s32 4294967294, %s2601_s26  }
  0x14   : > { %3141 = sst [smem:[#allocation16_spill]] %s2597_s25  ;;  %p69_p0 = scmp.ne.s32.totalorder %s2585_s22, %s2581_s21 }
  0x15   : > { %p70_p1 = scmp.eq.s32.totalorder %s2731_s27, 0  ;;  %p421_p3 = scmp.eq.s32.totalorder %s2119_s28, 1 }
  0x16   : > { %p2120_p5 = scmp.ge.s32.totalorder %s2601_s26, 1  ;;  %p428_p7 = scmp.lt.s32.totalorder %s2601_s26, 3 }
  0x17   : > { %p2740_p4 = por %p70_p1, %p69_p0  ;;  %p2745_p6 = por %p421_p3, %p69_p0 }
  0x18   : > { %p2750_p8 = pnand %p2120_p5, %p428_p7  ;;  %s2603_s17 = smov [#allocation8]  }
  0x19   : > { %s3143_s30 = scalar_select %p2745_p6, 1, 0 }
  0x1a   : > { %s458_s18 = sshll.u32 %s2603_s17, 4  ;;  %p2335_p9 = pneg %p2750_p8  ;;  %s459_s18 = int_to_ptr.vmem [resolvable:$true] %s458_s18 }
  0x1b   : > { %3144 = sst [smem:[#allocation17_spill]] %s3143_s30  ;;  %s47_s20 = sadd.s32 1, %s2597_s25 }
  0x1c   : > { %p2759_p11 = pnand %p2335_p9, %p70_p1  ;;  %s2442_s28 = scalar_lea.vmem %s459_s18, 512 }
  0x1d   : > { %p2443_p13 = scmp.ne.s32.totalorder %s459_s18, %s2442_s28  ;;  %p2450_p5 = scmp.lt.s32.totalorder %s459_s18, %s459_s18 }
  0x1e   : > { %p2433_p12 = pneg %p2759_p11  ;;  %p2451_p7 = scmp.lt.s32.totalorder %s2442_s28, %s2442_s28 }
  0x20   : > { %p2445_p0 = pnand %p2443_p13, %p2433_p12  ;;  %p2452_p2 = por %p2451_p7, %p2450_p5 }
  0x22   : > { %p2446_p3 = pneg %p2445_p0 }
  0x24   : > { %p2453_p6 = pnand %p2452_p2, %p2446_p3 }
  0x26   : > { %2456 = shalt.err (!%p2453_p6)
}
  0x27   : > { %s2604_s17 = smov 128   ;;  %s2605_s30 = smov 8  }
  0x28   : > { %s3147_s8 = sld [smem:[#allocation21_spill]]  ;;  %p49_p2 = scmp.ge.s32.totalorder %s47_s20, 2 }
  0x29   : > { %s56_s28 = sadd.s32 1, %s2589_s23  ;;  %p63_p6 = scmp.ne.s32.totalorder %s2589_s23, %s2585_s22 }
  0x2a   : > { %p64_p9 = scmp.eq.s32.totalorder %s2601_s26, 0  ;;  %s3174_s20 = smov (%p49_p2, %s47_s20), 0 }
  0x2b   : > { %3148 = sst [smem:[#allocation18_spill]] %s3174_s20  ;;  %p3150_p13 = scmp.eq.s32.totalorder %s2731_s27, 1 }
  0x2c   : > { %p2777_p12 = por %p64_p9, %p63_p6  ;;  %s51_s16 = ssub.s32 %s2597_s25, %s3174_s20 }
  0x2d   : > { %p2783_p0 = por %p3150_p13, %p63_p6  ;;  %p54_p3 = scmp.eq.s32.totalorder %s51_s16, 0 }
  0x2e   : > { %2338 = dma.hbm_to_vmem [thread:$0]  (!%p2759_p11), %s3147_s8, 512, %s459_s18, [#allocation7], %s2604_s17, %s2604_s17, %s2605_s30  }
  0x2f   : > { %s3151_s19 = scalar_select %p2783_p0, 1, 0 }
  0x30   : > { %p2351_p11 = scmp.lt.s32.totalorder %s2601_s26, 2  ;;  %s493_s21 = sand.u32 1, %s2589_s23  }
  0x31   : > { %3152 = sst [smem:[#allocation19_spill]] %s3151_s19  ;;  %s2123_s30 = sshll.u32 %s493_s21, 3 }
  0x32   : > { %s2792_s18 = scalar_select %p54_p3, %s2589_s23, %s56_s28  }
  0x33   : > { %s2124_s17 = sshll.u32 %s2597_s25, 7  ;;  %s3153_s24 = sld [smem:[#allocation20_spill]] }
  0x34   : > { %s497_s9 = scalar_lea.vmem [#allocation3], %s2123_s30  ;;  %p2800_p5 = pnand %p2351_p11, %p2777_p12 }
  0x35   : > { %s505_s13 = sshll.u32 %s497_s9, 4  ;;  %s2807_s28 = scalar_lea.hbm %s3107_s1, %s2124_s17  ;;  %s506_s13 = int_to_ptr.vmem [resolvable:$true] %s505_s13 }
  0x36   : > { %s512_s16 = sand.u32 1, %s2601_s26   ;;  %s494_s25 = scalar_lea.sflag [#allocation4], %s493_s21 }
  0x37   : > { %p2459_p7 = pneg %p2800_p5  ;;  %s2470_s8 = scalar_lea.vmem %s506_s13, 128 }
  0x38   : > { %p2471_p2 = scmp.ne.s32.totalorder %s506_s13, %s2470_s8  ;;  %s2606_s9 = smov [#allocation3]  }
  0x39   : > { %s503_s11 = scalar_lea.hbm %s3153_s24, %s2124_s17  ;;  %s2475_s14 = sshll.u32 %s2606_s9, 4  ;;  %s2476_s14 = int_to_ptr.vmem [resolvable:$false] %s2475_s14 }
  0x3a   : > { %p2473_p6 = pnand %p2471_p2, %p2459_p7  ;;  %s2477_s15 = scalar_lea.vmem %s2476_s14, 256 }
  0x3b   : > { %p2478_p12 = scmp.lt.s32.totalorder %s506_s13, %s2476_s14  ;;  %p2479_p13 = scmp.lt.s32.totalorder %s2477_s15, %s2470_s8 }
  0x3c   : > { %p2474_p9 = pneg %p2473_p6 }
  0x3d   : > { %p2480_p11 = por %p2479_p13, %p2478_p12 }
  0x3f   : > { %p2481_p3 = pnand %p2480_p11, %p2474_p9 }
  0x41   : > { %2484 = shalt.err (!%p2481_p3)
}
  0x42   : > { %2342 = dma.hbm_to_vmem [thread:$0]  (!%p2800_p5), %s503_s11, 128, %s506_s13, %s494_s25  }
  0x43   : > { %s516_s24 = scalar_lea.vmem [#allocation6], %s2123_s30  ;;  %s513_s19 = scalar_lea.sflag [#allocation7], %s512_s16 }
  0x44   : > { %s523_s20 = sshll.u32 %s516_s24, 4  ;;  %s2607_s17 = smov [#allocation6]   ;;  %s524_s20 = int_to_ptr.vmem [resolvable:$true] %s523_s20 }
  0x45   : > { %s2498_s21 = scalar_lea.vmem %s524_s20, 128  ;;  %s2503_s9 = sshll.u32 %s2607_s17, 4  ;;  %s2504_s9 = int_to_ptr.vmem [resolvable:$false] %s2503_s9 }
  0x46   : > { %p2499_p2 = scmp.ne.s32.totalorder %s524_s20, %s2498_s21  ;;  %s2505_s8 = scalar_lea.vmem %s2504_s9, 256 }
  0x47   : > { %p2506_p9 = scmp.lt.s32.totalorder %s524_s20, %s2504_s9  ;;  %p2507_p12 = scmp.lt.s32.totalorder %s2505_s8, %s2498_s21 }
  0x48   : > { %p2501_p6 = pnand %p2499_p2, %p2459_p7 }
  0x49   : > { %p2508_p13 = por %p2507_p12, %p2506_p9 }
  0x4a   : > { %p2502_p10 = pneg %p2501_p6 }
  0x4c   : > { %p2509_p11 = pnand %p2508_p13, %p2502_p10 }
  0x4e   : > { %2512 = shalt.err (!%p2509_p11)
}
  0x4f   : > { %2345 = dma.hbm_to_vmem [thread:$0]  (!%p2800_p5), %s2807_s28, 128, %s524_s20, %s513_s19  }
  0x50   : > { %532 = sbr.rel (%p2750_p8) target bundleno = 3947 (0xf6b), region = 84  ;;  %s2826_s11 = sand.u32 (!%p2750_p8), 1, %s2585_s22  }
  0x51   : > { %s2829_s13 = sshll.u32 (!%p2750_p8), %s2826_s11, 3  ;;  %s535_s25 = scalar_lea.sflag (!%p2750_p8), [#allocation4], %s2826_s11 }
  0x52   : > { %s538_s30 = scalar_lea.vmem (!%p2750_p8), [#allocation3], %s2829_s13 }
  0x55   : > { %2564 = dma.done.wait (%p2740_p4), %s535_s25, 128  }
  0x56   : > { %2566 = vsyncadd (%p2740_p4), %s535_s25, 4294967168  ;;  %s543_s12 = sand.u32 1, %s2731_s27   ;;  %s547_s28 = scalar_lea.vmem [#allocation6], %s2829_s13 }
  0x57   : > { %s544_s0 = scalar_lea.sflag [#allocation7], %s543_s12 }
  0x58   : > { %2568 = dma.done.wait (%p2740_p4), %s544_s0, 128  }
  0x59   : > { %2570 = vsyncadd (%p2740_p4), %s544_s0, 4294967168 }
  0x5a   : > { %2572 = dma.done.wait (%p70_p1), [#allocation7], 512  }
  0x5b   : > { %2574 = vsyncadd (%p70_p1), [#allocation7], 4294966784  ;;  %v2608_v0 = vmov 0.0   ;;  %vm2609_vm0 = vmmov 0   ;;  %v614_v1 = vld [vmem:[%s3110_s4 + $0x18] sm:$0xff]  ;;  %v613_v2 = vld [vmem:[%s3110_s4 + $0x10] sm:$0xff] }
  0x5c   : > { %2213 = vmatprep.subr.mxu0 %v2608_v0  ;;  %2221 = vmatprep.mubr.msk.f32.mxu0 %vm2609_vm0, %v2608_v0  ;;  %v706_v3 = vld [vmem:[%s3108_s2 + $0x18] sm:$0xff]  ;;  %v612_v4 = vld [vmem:[%s3110_s4 + $0x8] sm:$0xff]  ;;  %v705_v5 = vld [vmem:[%s3108_s2 + $0x10] sm:$0xff]  ;;  %vm622_vm1 = vcmask 261120   ;;  %s2610_s16 = smov 96   ;;  %vm792_vm2 = vcmask 64512  }
  0x5d   : > { %2224 = vmatprep.subr.mxu1 %v2608_v0  ;;  %2232 = vmatprep.mubr.msk.f32.mxu1 %vm2609_vm0, %v2608_v0  ;;  %v704_v6 = vld [vmem:[%s3108_s2 + $0x8] sm:$0xff]  ;;  %v611_v7 = vld [vmem:[%s3110_s4] sm:$0xff]  ;;  %v2884_v10 = vld [vmem:[%s538_s30] sm:$0xff]  ;;  %s2611_s27 = smov 120   ;;  %s2612_s24 = smov 112   ;;  %vm1886_vm3 = vcmask 523264  }
  0x5e   : > { %2214 = vmatpush3.msra.mxu0 %v614_v1  ;;  %2225 = vmatpush3.msra.mxu1 %v706_v3  ;;  %v610_v8 = vld [vmem:[%s547_s28] sm:$0xff]  ;;  %s2613_s9 = smov 104   ;;  %s3155_s25 = sld [smem:[#allocation24_spill]] }
  0x5f   : > { %2215 = vmatprep.subr.mxu0 %v2608_v0  ;;  %2226 = vmatprep.subr.mxu1 %v2608_v0  ;;  %v703_v9 = vld [vmem:[%s3108_s2] sm:$0xff]  ;;  %v1120_v47 = vld [vmem:[%s3112_s6 + $0x8] sm:$0xff]  ;;  %s3156_s29 = sld [smem:[#allocation25_spill]]  ;;  %s604_s15 = scalar_lea.vmem [#allocation9], %s2829_s13 }
  0x60   : > { %2216 = vmatpush3.msra.mxu0 %v613_v2  ;;  %2227 = vmatpush3.msra.mxu1 %v705_v5  ;;  %v2132_v11 = vld [vmem:[%s3111_s5] ss:$0 sm:$0xff]  ;;  %s3157_s19 = sld [smem:[#allocation22_spill]]  ;;  %s1992_s17 = scalar_lea.sflag [#allocation5], %s2826_s11 }
  0x61   : > { %2217 = vmatprep.subr.mxu0 %v2608_v0  ;;  %2228 = vmatprep.subr.mxu1 %v2608_v0  ;;  %v2134_v16 = vld [vmem:[%s3109_s3] ss:$0 sm:$0xff]  ;;  %s3159_s8 = sld [smem:[#allocation15_spill]]  ;;  %s2614_s12 = smov [#allocation9]  }
  0x62   : > { %2218 = vmatpush3.msra.mxu0 %v612_v4  ;;  %2229 = vmatpush3.msra.mxu1 %v704_v6  ;;  %v953_v51 = vld [vmem:[%s3112_s6] sm:$0xff]  ;;  %s2517_s0 = sshll.u32 %s2614_s12, 4  ;;  %s2518_s0 = int_to_ptr.vmem [resolvable:$false] %s2517_s0 }
  0x63   : > { %2219 = vmatprep.subr.mxu0 %v2608_v0  ;;  %2230 = vmatprep.subr.mxu1 %v2608_v0  ;;  %s2519_s13 = scalar_lea.vmem %s2518_s0, 256 }
  0x64   : > { %2220 = vmatpush3.msra.mxu0 %v611_v7  ;;  %2231 = vmatpush3.msra.mxu1 %v703_v9 }
  0x65   : > { %2222 = vmatmul.mubr.msk.f32.vlgmr.msra.gmra.mxu0 %vm622_vm1, %v610_v8  ;;  %2233 = vmatmul.mubr.msk.f32.vlgmr.msra.gmra.mxu1 %vm622_vm1, %v2884_v10 }
  0x66   : > { %2235 = vmatprep.subr.mxu0 %v2608_v0  ;;  %2237 = vmatprep.mubr.msk.f32.mxu0 %vm2609_vm0, %v2608_v0 }
  0x67   : > { %2250 = vmatprep.subr.mxu1 %v2608_v0  ;;  %2252 = vmatprep.mubr.msk.f32.mxu1 %vm2609_vm0, %v2608_v0  ;;  %s2162_s14 = sshll.u32 %s3159_s8, 7 }
 0x125   : > { %v692_v12 = vpop.f32.mrf.mxu0  ;;  %v784_v14 = vpop.f32.mrf.mxu1 }
 0x126   : > { %v693_v13 = vadd.f32 %v2132_v11, %v692_v12  ;;  %v785_v18 = vadd.f32 %v2134_v16, %v784_v14  ;;  %v1432_v12 = vld [vmem:[%s3112_s6 + $0x10] sm:$0xff] }
 0x127   : > { %v2223_v15 = vpop.f32.mrf.mxu0  ;;  %v2234_v17 = vpop.f32.mrf.mxu1 }
 0x128   : > { %696 = vst.msk [vmem:[#allocation2] sm:$0xff] %vm622_vm1, %v693_v13  ;;  %698 = vrot.lane.b32.xlu1 %v693_v13, %s2610_s16  ;;  %v2903_v19 = vmul.f32 0.35355338, %v785_v18  ;;  %s3162_s16 = sld [smem:[#allocation27_spill]] }
 0x12f   : > { %v2905_v20 = vld [vmem:[#allocation2] sm:$0xff] }
 0x130   : > { %956 = vrot.lane.b32.xlu1 %v2905_v20, %s2611_s27  ;;  %2236 = vmatpush3.xpose.msk.msra.mxu0 %vm792_vm2, %v2905_v20 }
 0x131   : > { %2240 = vmatprep.subr.mxu0 %v2608_v0 }
 0x133   : > { %2238 = vmatmul.mubr.msk.f32.vlgmr.msra.gmra.mxu0 %vm792_vm2, %v2903_v19 }
 0x134   : > { %2242 = vmatprep.mubr.msk.f32.mxu0 %vm2609_vm0, %v2608_v0 }
 0x19a   : > { %v699_v21 = vpop.permute.xlu1 %698 }
 0x19b   : > { %702 = vst.msk [vmem:[#allocation2 + $0x8] sm:$0xff] %vm622_vm1, %v699_v21 }
 0x1a2   : > { %v2917_v22 = vld [vmem:[#allocation2 + $0x8] sm:$0xff]  ;;  %v957_v34 = vpop.permute.xlu1 %956 }
 0x1a3   : > { %2241 = vmatpush3.msra.mxu0 %v2917_v22 }
 0x1a4   : > { %2245 = vmatprep.subr.mxu0 %v2608_v0 }
 0x1f3   : > { %v865_v23 = vpop.f32.mrf.mxu0 }
 0x1f4   : > { %v869_v24 = vsel %vm792_vm2, %v865_v23, -inf }
 0x1f5   : > { %870 = vmax.xlane.f32.xlu0 %v869_v24  ;;  %v2239_v25 = vpop.f32.mrf.mxu0 }
 0x1f6   : > { %v1672_v25 = vld [vmem:[%s3112_s6 + $0x18] sm:$0xff] }
 0x27e   : > { %v871_v26 = vpop.xlane.xlu0 %870 }
 0x27f   : > { %v872_v27 = vsub.f32 %v865_v23, %v871_v26 }
 0x281   : > { %v873_v28 = vmul.f32 1.442695, %v872_v27 }
 0x283   : > { %2411 = vpow2.f32 %v873_v28 }
 0x290   : > { %v2412_v29 = vpop.eup %2411 }
 0x291   : > { %v875_v30 = vsel %vm792_vm2, %v2412_v29, 0.0 }
 0x292   : > { %876 = vadd.xlane.f32.xlu0 %v875_v30 }
 0x2a8   : > { %954 = vrot.lane.b32.xlu0 %v2903_v19, %s2611_s27 }
 0x31b   : > { %v877_v31 = vpop.xlane.xlu0 %876 }
 0x31c   : > { %2413 = vrcp.f32 %v877_v31 }
 0x31f   : > { %v955_v35 = vpop.permute.xlu0 %954 }
 0x329   : > { %v2414_v32 = vpop.eup %2413 }
 0x32a   : > { %v879_v33 = vmul.f32 %v2414_v32, %v2412_v29 }
 0x32c   : > { %2243 = vmatmul.mubr.msk.f32.vlgmr.msra.gmra.mxu0 %vm792_vm2, %v879_v33 }
 0x32d   : > { %2246 = vmatpush3.xpose.msk.msra.mxu0 %vm792_vm2, %v957_v34  ;;  %2247 = vmatprep.mubr.msk.f32.mxu0 %vm2609_vm0, %v2608_v0 }
 0x32e   : > { %2255 = vmatprep.subr.mxu0 %v2608_v0 }
 0x330   : > { %2248 = vmatmul.mubr.msk.f32.vlgmr.msra.gmra.mxu0 %vm792_vm2, %v955_v35  ;;  %v2152_v35 = vld [vmem:[%s3113_s7] ss:$0 sm:$0xff] }
 0x331   : > { %2257 = vmatprep.mubr.msk.f32.mxu0 %vm2609_vm0, %v2608_v0  ;;  %2256 = vmatpush3.msra.mxu0 %v1120_v47  ;;  %v1788_v47 = vld [vmem:[#allocation8 + $0x10] sm:$0xff] }
 0x332   : > { %2265 = vmatprep.subr.mxu0 %v2608_v0 }
 0x3ec   : > { %v949_v36 = vpop.f32.mrf.mxu0 }
 0x3ee   : > { %v2244_v37 = vpop.f32.mrf.mxu0 }
 0x3f0   : > { %v1028_v38 = vpop.f32.mrf.mxu0 }
 0x3f1   : > { %v1032_v39 = vsel %vm792_vm2, %v1028_v38, -inf }
 0x3f2   : > { %1033 = vmax.xlane.f32.xlu1 %v1032_v39  ;;  %v2249_v40 = vpop.f32.mrf.mxu0 }
 0x403   : > { %1044 = vrot.lane.b32.xlu1 %v2917_v22, %s2611_s27  ;;  %s2006_s27 = sshll.u32 %s604_s15, 4  ;;  %s2007_s27 = int_to_ptr.vmem [resolvable:$true] %s2006_s27 }
 0x404   : > { %p2520_p10 = scmp.lt.s32.totalorder %s2007_s27, %s2518_s0 }
 0x407   : > { %1267 = vrot.lane.b32.xlu1 %v2903_v19, %s2612_s24 }
 0x47b   : > { %v1034_v41 = vpop.xlane.xlu1 %1033 }
 0x47c   : > { %v1035_v42 = vsub.f32 %v1028_v38, %v1034_v41 }
 0x47e   : > { %v1036_v43 = vmul.f32 1.442695, %v1035_v42 }
 0x47f   : > { %v1045_v44 = vpop.permute.xlu1 %1044 }
 0x480   : > { %2415 = vpow2.f32 %v1036_v43  ;;  %2251 = vmatpush3.msra.mxu1 %v1045_v44 }
 0x481   : > { %2260 = vmatprep.subr.mxu1 %v2608_v0 }
 0x483   : > { %v1268_v55 = vpop.permute.xlu1 %1267 }
 0x48d   : > { %v2416_v45 = vpop.eup %2415 }
 0x48e   : > { %v1038_v46 = vsel %vm792_vm2, %v2416_v45, 0.0 }
 0x48f   : > { %1039 = vadd.xlane.f32.xlu0 %v1038_v46  ;;  %v1789_v46 = vld [vmem:[#allocation8 + $0x18] sm:$0xff] }
 0x4a5   : > { %1269 = vrot.lane.b32.xlu0 %v2905_v20, %s2612_s24 }
 0x518   : > { %v1040_v48 = vpop.xlane.xlu0 %1039 }
 0x519   : > { %2417 = vrcp.f32 %v1040_v48  ;;  %v1787_v48 = vld [vmem:[#allocation8 + $0x8] sm:$0xff] }
 0x51c   : > { %v1270_v53 = vpop.permute.xlu0 %1269 }
 0x526   : > { %v2418_v49 = vpop.eup %2417 }
 0x527   : > { %v1042_v50 = vmul.f32 %v2418_v49, %v2416_v45  ;;  %v1878_v49 = vld [vmem:[%s3116_s10 + $0x38] sm:$0xff] }
 0x529   : > { %2253 = vmatmul.mubr.msk.f32.vlgmr.msra.gmra.mxu1 %vm792_vm2, %v1042_v50  ;;  %v1877_v50 = vld [vmem:[%s3116_s10 + $0x30] sm:$0xff] }
 0x52a   : > { %2261 = vmatpush3.msra.mxu1 %v953_v51  ;;  %2262 = vmatprep.mubr.msk.f32.mxu1 %vm2609_vm0, %v2608_v0  ;;  %v1876_v51 = vld [vmem:[%s3116_s10 + $0x28] sm:$0xff] }
 0x52b   : > { %2270 = vmatprep.subr.mxu1 %v2608_v0 }
 0x52d   : > { %2263 = vmatmul.mubr.msk.f32.vlgmr.msra.gmra.mxu1 %vm792_vm2, %v949_v36 }
 0x52e   : > { %2272 = vmatprep.mubr.msk.f32.mxu1 %vm2609_vm0, %v2608_v0 }
 0x5e9   : > { %v1116_v52 = vpop.f32.mrf.mxu1 }
 0x5ea   : > { %2258 = vmatmul.mubr.msk.f32.vlgmr.msra.gmra.mxu0 %vm792_vm2, %v1116_v52  ;;  %v1875_v52 = vld [vmem:[%s3116_s10 + $0x20] sm:$0xff] }
 0x5eb   : > { %2266 = vmatpush3.xpose.msk.msra.mxu0 %vm792_vm2, %v1270_v53  ;;  %v2254_v54 = vpop.f32.mrf.mxu1  ;;  %2267 = vmatprep.mubr.msk.f32.mxu0 %vm2609_vm0, %v2608_v0  ;;  %v1874_v53 = vld [vmem:[%s3116_s10 + $0x18] sm:$0xff] }
 0x5ec   : > { %2275 = vmatprep.subr.mxu0 %v2608_v0 }
 0x5ed   : > { %v1263_v56 = vpop.f32.mrf.mxu1 }
 0x5ee   : > { %2268 = vmatmul.mubr.msk.f32.vlgmr.msra.gmra.mxu0 %vm792_vm2, %v1268_v55 }
 0x5ef   : > { %v2264_v57 = vpop.f32.mrf.mxu1  ;;  %2277 = vmatprep.mubr.msk.f32.mxu0 %vm2609_vm0, %v2608_v0  ;;  %2276 = vmatpush3.msra.mxu0 %v1432_v12 }
 0x5f0   : > { %2285 = vmatprep.subr.mxu0 %v2608_v0 }
 0x6aa   : > { %v1190_v58 = vpop.f32.mrf.mxu0 }
 0x6ac   : > { %v2259_v59 = vpop.f32.mrf.mxu0 }
 0x6ae   : > { %v1341_v60 = vpop.f32.mrf.mxu0 }
 0x6af   : > { %v1345_v61 = vsel %vm792_vm2, %v1341_v60, -inf }
 0x6b0   : > { %1346 = vmax.xlane.f32.xlu1 %v1345_v61  ;;  %v2269_v62 = vpop.f32.mrf.mxu0 }
 0x6c1   : > { %1356 = vrot.lane.b32.xlu1 %v2917_v22, %s2612_s24 }
 0x6c5   : > { %1507 = vrot.lane.b32.xlu1 %v2903_v19, %s2613_s9 }
 0x739   : > { %v1347_v63 = vpop.xlane.xlu1 %1346 }
 0x73a   : > { %v1348_v1 = vsub.f32 %v1341_v60, %v1347_v63  ;;  %v2154_v60 = vld [vmem:[%s3156_s29] ss:$0 sm:$0xff]  ;;  %v1873_v63 = vld [vmem:[%s3116_s10 + $0x10] sm:$0xff]  ;;  %s3161_s29 = sld [smem:[#allocation26_spill]] }
 0x73c   : > { %v1349_v2 = vmul.f32 1.442695, %v1348_v1  ;;  %v1872_v1 = vld [vmem:[%s3116_s10 + $0x8] sm:$0xff] }
 0x73d   : > { %v1357_v3 = vpop.permute.xlu1 %1356 }
 0x73e   : > { %2419 = vpow2.f32 %v1349_v2  ;;  %2271 = vmatpush3.msra.mxu1 %v1357_v3  ;;  %v1871_v2 = vld [vmem:[%s3116_s10] sm:$0xff] }
 0x73f   : > { %2280 = vmatprep.subr.mxu1 %v2608_v0  ;;  %v2155_v3 = vld [vmem:[%s3157_s19] ss:$0 sm:$0xff]  ;;  %s3163_s19 = sld [smem:[#allocation28_spill]] }
 0x741   : > { %v1508_v11 = vpop.permute.xlu1 %1507 }
 0x745   : > { %s2004_s21 = scalar_lea.hbm %s3163_s19, %s2162_s14 }
 0x74b   : > { %v2420_v4 = vpop.eup %2419 }
 0x74c   : > { %v1351_v5 = vsel %vm792_vm2, %v2420_v4, 0.0 }
 0x74d   : > { %1352 = vadd.xlane.f32.xlu0 %v1351_v5 }
 0x763   : > { %1509 = vrot.lane.b32.xlu0 %v2905_v20, %s2613_s9 }
 0x7d6   : > { %v1353_v6 = vpop.xlane.xlu0 %1352 }
 0x7d7   : > { %2421 = vrcp.f32 %v1353_v6 }
 0x7da   : > { %v1510_v9 = vpop.permute.xlu0 %1509 }
 0x7e4   : > { %v2422_v7 = vpop.eup %2421 }
 0x7e5   : > { %v1355_v8 = vmul.f32 %v2422_v7, %v2420_v4 }
 0x7e7   : > { %2273 = vmatmul.mubr.msk.f32.vlgmr.msra.gmra.mxu1 %vm792_vm2, %v1355_v8 }
 0x7e8   : > { %2281 = vmatpush3.xpose.msk.msra.mxu1 %vm792_vm2, %v1510_v9  ;;  %2282 = vmatprep.mubr.msk.f32.mxu1 %vm2609_vm0, %v2608_v0 }
 0x7e9   : > { %2290 = vmatprep.subr.mxu1 %v2608_v0 }
 0x7eb   : > { %2283 = vmatmul.mubr.msk.f32.vlgmr.msra.gmra.mxu1 %vm792_vm2, %v1508_v11 }
 0x7ec   : > { %2292 = vmatprep.mubr.msk.f32.mxu1 %vm2609_vm0, %v2608_v0  ;;  %2291 = vmatpush3.msra.mxu1 %v1672_v25 }
 0x7ed   : > { %2306 = vmatprep.subr.mxu1 %v2608_v0 }
 0x8a7   : > { %v1428_v13 = vpop.f32.mrf.mxu1 }
 0x8a8   : > { %2278 = vmatmul.mubr.msk.f32.vlgmr.msra.gmra.mxu0 %vm792_vm2, %v1428_v13 }
 0x8a9   : > { %v2274_v14 = vpop.f32.mrf.mxu1  ;;  %2287 = vmatprep.mubr.msk.f32.mxu0 %vm2609_vm0, %v2608_v0 }
 0x8ab   : > { %v1581_v15 = vpop.f32.mrf.mxu1 }
 0x8ac   : > { %v1585_v16 = vsel %vm792_vm2, %v1581_v15, -inf }
 0x8ad   : > { %1586 = vmax.xlane.f32.xlu1 %v1585_v16  ;;  %v2284_v17 = vpop.f32.mrf.mxu1 }
 0x8be   : > { %1596 = vrot.lane.b32.xlu1 %v2917_v22, %s2613_s9  ;;  %v1264_v22 = vadd.f32 %v1263_v56, %v1190_v58  ;;  %v2153_v58 = vld [vmem:[%s3155_s25] ss:$0 sm:$0xff]  ;;  %s3158_s9 = sld [smem:[#allocation23_spill]] }
 0x8c4   : > { %v2157_v8 = vld [vmem:[%s3158_s9] ss:$0 sm:$0xff]  ;;  %s2513_s9 = scalar_lea.vmem %s2007_s27, 128 }
 0x8c5   : > { %p2514_p1 = scmp.ne.s32.totalorder %s2007_s27, %s2513_s9  ;;  %p2521_p5 = scmp.lt.s32.totalorder %s2519_s13, %s2513_s9 }
 0x8c7   : > { %p2515_p4 = pnand %p2514_p1, %p2783_p0  ;;  %p2522_p7 = por %p2521_p5, %p2520_p10 }
 0x8c9   : > { %p2516_p8 = pneg %p2515_p4 }
 0x8cb   : > { %p2523_p3 = pnand %p2522_p7, %p2516_p8 }
 0x936   : > { %v1587_v18 = vpop.xlane.xlu1 %1586 }
 0x937   : > { %v1588_v19 = vsub.f32 %v1581_v15, %v1587_v18 }
 0x939   : > { %v1589_v20 = vmul.f32 1.442695, %v1588_v19 }
 0x93a   : > { %v1597_v21 = vpop.permute.xlu1 %1596 }
 0x93b   : > { %2423 = vpow2.f32 %v1589_v20  ;;  %2286 = vmatpush3.msra.mxu0 %v1597_v21 }
 0x93c   : > { %2295 = vmatprep.subr.mxu0 %v2608_v0 }
 0x948   : > { %v2424_v23 = vpop.eup %2423 }
 0x949   : > { %v1591_v24 = vsel %vm792_vm2, %v2424_v23, 0.0 }
 0x94a   : > { %1592 = vadd.xlane.f32.xlu0 %v1591_v24  ;;  %v2159_v24 = vld [vmem:[%s3161_s29] ss:$0 sm:$0xff] }
 0x968   : > { %v1502_v26 = vpop.f32.mrf.mxu0 }
 0x969   : > { %v1506_v27 = vadd.f32 %v1502_v26, %v1264_v22  ;;  %v2160_v22 = vld [vmem:[%s3162_s16] ss:$0 sm:$0xff] }
 0x96a   : > { %v2279_v28 = vpop.f32.mrf.mxu0 }
 0x9d3   : > { %v1593_v29 = vpop.xlane.xlu0 %1592 }
 0x9d4   : > { %2425 = vrcp.f32 %v1593_v29 }
 0x9e1   : > { %v2426_v30 = vpop.eup %2425 }
 0x9e2   : > { %v1595_v31 = vmul.f32 %v2426_v30, %v2424_v23 }
 0x9e4   : > { %2288 = vmatmul.mubr.msk.f32.vlgmr.msra.gmra.mxu0 %vm792_vm2, %v1595_v31 }
 0x9e5   : > { %2303 = vmatprep.mubr.msk.f32.mxu0 %vm2609_vm0, %v2608_v0  ;;  %2296 = vmatpush3.msra.mxu0 %v1789_v46 }
 0x9e6   : > { %2297 = vmatprep.subr.mxu0 %v2608_v0 }
 0x9e7   : > { %2298 = vmatpush3.msra.mxu0 %v1788_v47 }
 0x9e8   : > { %2299 = vmatprep.subr.mxu0 %v2608_v0 }
 0x9e9   : > { %2300 = vmatpush3.msra.mxu0 %v1787_v48 }
 0x9ea   : > { %2301 = vmatprep.subr.mxu0 %v2608_v0 }
 0xaa4   : > { %v1668_v32 = vpop.f32.mrf.mxu0 }
 0xaa5   : > { %2293 = vmatmul.mubr.msk.f32.vlgmr.msra.gmra.mxu1 %vm792_vm2, %v1668_v32 }
 0xaa6   : > { %v2289_v33 = vpop.f32.mrf.mxu0  ;;  %2322 = vmatprep.mubr.msk.f32.mxu1 %vm2609_vm0, %v2608_v0  ;;  %2307 = vmatpush3.msra.mxu1 %v1878_v49 }
 0xaa7   : > { %2308 = vmatprep.subr.mxu1 %v2608_v0 }
 0xaa8   : > { %2309 = vmatpush3.msra.mxu1 %v1877_v50 }
 0xaa9   : > { %2310 = vmatprep.subr.mxu1 %v2608_v0 }
 0xaaa   : > { %2311 = vmatpush3.msra.mxu1 %v1876_v51 }
 0xaab   : > { %2312 = vmatprep.subr.mxu1 %v2608_v0 }
 0xaac   : > { %2313 = vmatpush3.msra.mxu1 %v1875_v52 }
 0xaad   : > { %2314 = vmatprep.subr.mxu1 %v2608_v0 }
 0xaae   : > { %2315 = vmatpush3.msra.mxu1 %v1874_v53 }
 0xaaf   : > { %2316 = vmatprep.subr.mxu1 %v2608_v0 }
 0xab0   : > { %2317 = vmatpush3.msra.mxu1 %v1873_v63 }
 0xab1   : > { %2318 = vmatprep.subr.mxu1 %v2608_v0 }
 0xab2   : > { %2319 = vmatpush3.msra.mxu1 %v1872_v1 }
 0xab3   : > { %2320 = vmatprep.subr.mxu1 %v2608_v0 }
 0xab4   : > { %2321 = vmatpush3.msra.mxu1 %v1871_v2 }
 0xb65   : > { %v1742_v34 = vpop.f32.mrf.mxu1 }
 0xb66   : > { %v1746_v36 = vadd.f32 %v1742_v34, %v1506_v27 }
 0xb67   : > { %v2294_v37 = vpop.f32.mrf.mxu1 }
 0xb68   : > { %v1754_v38 = vadd.f32 %v2152_v35, %v1746_v36 }
 0xb6a   : > { %v1755_v39 = vadd.f32 %v1754_v38, %v2884_v10  ;;  %v1786_v10 = vld [vmem:[#allocation8] sm:$0xff] }
 0xb6b   : > { %2302 = vmatpush3.msra.mxu0 %v1786_v10 }
 0xb6c   : > { %v1756_v40 = vsel %vm622_vm1, %v1755_v39, 0.0 }
 0xb6d   : > { %1757 = vadd.xlane.f32.xlu0 %v1756_v40 }
 0xbf6   : > { %v1758_v41 = vpop.xlane.xlu0 %1757 }
 0xbf7   : > { %v1760_v42 = vmul.f32 0.03125, %v1758_v41 }
 0xbf9   : > { %v1761_v43 = vsub.f32 %v1755_v39, %v1760_v42 }
 0xbfb   : > { %v1762_v44 = vmul.f32 %v1761_v43, %v1761_v43 }
 0xbfd   : > { %v1763_v45 = vsel %vm622_vm1, %v1762_v44, 0.0 }
 0xbfe   : > { %1764 = vadd.xlane.f32.xlu0 %v1763_v45 }
 0xc87   : > { %v1765_v54 = vpop.xlane.xlu0 %1764 }
 0xc88   : > { %v1766_v55 = vmul.f32 0.03125, %v1765_v54 }
 0xc8a   : > { %v1767_v56 = vadd.f32 1e-05, %v1766_v55 }
 0xc8c   : > { %2427 = vrsqrt.f32 %v1767_v56 }
 0xc99   : > { %v2428_v57 = vpop.eup %2427 }
 0xc9a   : > { %v1769_v59 = vmul.f32 %v2428_v57, %v1761_v43 }
 0xc9c   : > { %v1777_v61 = vmul.f32 %v2153_v58, %v1769_v59 }
 0xc9e   : > { %v1785_v62 = vadd.f32 %v2154_v60, %v1777_v61 }
 0xca0   : > { %2304 = vmatmul.mubr.msk.f32.vlgmr.msra.gmra.mxu0 %vm622_vm1, %v1785_v62 }
 0xd60   : > { %v1866_v4 = vpop.f32.mrf.mxu0 }
 0xd61   : > { %v1867_v5 = vadd.f32 %v2155_v3, %v1866_v4 }
 0xd62   : > { %v2305_v6 = vpop.f32.mrf.mxu0 }
 0xd63   : > { %v1870_v7 = vmax.f32 %v1867_v5, 0.0 }
 0xd65   : > { %2323 = vmatmul.mubr.msk.f32.vlgmr.msra.gmra.mxu1 %vm1886_vm3, %v1870_v7 }
 0xe25   : > { %v1956_v9 = vpop.f32.mrf.mxu1 }
 0xe26   : > { %v1957_v11 = vadd.f32 %v2157_v8, %v1956_v9 }
 0xe27   : > { %v2324_v12 = vpop.f32.mrf.mxu1 }
 0xe28   : > { %v1960_v13 = vadd.f32 %v1957_v11, %v1785_v62 }
 0xe2a   : > { %v1961_v0 = vsel %vm622_vm1, %v1960_v13, 0.0 }
 0xe2b   : > { %1962 = vadd.xlane.f32.xlu0 %v1961_v0 }
 0xeb4   : > { %v1963_v14 = vpop.xlane.xlu0 %1962 }
 0xeb5   : > { %v1964_v15 = vmul.f32 0.03125, %v1963_v14 }
 0xeb7   : > { %v1965_v16 = vsub.f32 %v1960_v13, %v1964_v15 }
 0xeb9   : > { %v1966_v17 = vmul.f32 %v1965_v16, %v1965_v16 }
 0xebb   : > { %v1967_v18 = vsel %vm622_vm1, %v1966_v17, 0.0 }
 0xebc   : > { %1968 = vadd.xlane.f32.xlu1 %v1967_v18 }
 0xf45   : > { %v1969_v19 = vpop.xlane.xlu1 %1968 }
 0xf46   : > { %v1970_v20 = vmul.f32 0.03125, %v1969_v19 }
 0xf48   : > { %v1971_v21 = vadd.f32 1e-05, %v1970_v20 }
 0xf4a   : > { %2429 = vrsqrt.f32 %v1971_v21 }
 0xf57   : > { %v2430_v23 = vpop.eup %2429 }
 0xf58   : > { %v1973_v25 = vmul.f32 %v2430_v23, %v1965_v16 }
 0xf5a   : > { %v1981_v26 = vmul.f32 %v2159_v24, %v1973_v25 }
 0xf5c   : > { %v1989_v27 = vadd.f32 %v2160_v22, %v1981_v26 }
 0xf5e   : > { %1990 = vst.msk [vmem:[%s604_s15] sm:$0xff] %vm622_vm1, %v1989_v27 }
 0xf5f   : > { %2526 = shalt.err (!%p2523_p3)
}
 0xf60   : > { %s2527_s8 = scalar_lea.hbm %s2004_s21, 128  ;;  %s2531_s30 = scalar_lea.hbm %s3163_s19, 256 }
 0xf61   : > { %p2528_p2 = scmp.ne.s32.totalorder %s2004_s21, %s2527_s8  ;;  %p2532_p12 = scmp.lt.s32.totalorder %s2004_s21, %s3163_s19 }
 0xf62   : > { %p2533_p13 = scmp.lt.s32.totalorder %s2531_s30, %s2527_s8 }
 0xf63   : > { %p2529_p6 = pnand %p2528_p2, %p2783_p0 }
 0xf64   : > { %p2534_p11 = por %p2533_p13, %p2532_p12 }
 0xf65   : > { %p2530_p9 = pneg %p2529_p6 }
 0xf67   : > { %p2535_p1 = pnand %p2534_p11, %p2530_p9 }
 0xf69   : > { %2538 = shalt.err (!%p2535_p1)
}
 0xf6a   : > { %2333 = dma.vmem_to_hbm [thread:$0]  (%p2783_p0), %s2007_s27, 128, %s2004_s21, %s1992_s17  }
 0xf6b PF: > { %s3164_s14 = sld [smem:[#allocation14_spill]]  ;;  %p3167_p8 = scmp.ge.s32.totalorder %s2601_s26, 2 }
 0xf6c   : > { %s3165_s15 = sld [smem:[#allocation17_spill]] }
 0xf71   : > { %s2018_s24 = sand.u32 1, %s3164_s14  }
 0xf72   : > { %p3166_p4 = scmp.ne.s32.totalorder %s3165_s15, 0  ;;  %s2019_s20 = scalar_lea.sflag [#allocation5], %s2018_s24 }
 0xf74   : > { %p2347_p10 = pnand %p3167_p8, %p3166_p4 }
 0xf76   : > { %p2348_p5 = pneg %p2347_p10 }
 0xf78   : > { %2576 = dma.done.wait (%p2348_p5), %s2019_s20, 128  }
 0xf79   : > { %2578 = vsyncadd (%p2348_p5), %s2019_s20, 4294967168  ;;  %s35_s26 = sadd.s32 1, %s2601_s26   ;;  %s3168_s24 = sld [smem:[#allocation16_spill]] }
 0xf7a   : > { %p32_p7 = scmp.ge.s32.totalorder %s35_s26, 4   ;;  %s3169_s25 = sld [smem:[#allocation18_spill]] }
 0xf7b   : > { %s3170_s21 = smov %s2585_s22  ;;  %s3171_s22 = smov %s2589_s23 }
 0xf7c   : > { %s3172_s23 = smov %s2792_s18  ;;  %34 = sbr.rel (!%p32_p7) target bundleno = 18 (0x12), region = 152 }
 0xf81   :  { %2024 = vsyncpa [#allocation4], 1 }
 0xf82   :  { %2026 = vsyncpa [#allocation4 + $0x1], 1 }
 0xf83   :  { %2027 = vsyncpa [#allocation7], 1 }
 0xf84   :  { %2029 = vsyncpa [#allocation7 + $0x1], 1 }
 0xf85   :  { %2030 = vsyncpa [#allocation5], 1 }
 0xf86   :  { %2032 = vsyncpa [#allocation5 + $0x1], 1 }

</bundles_post_ra>
